<compile_context>
chip_gen: v6e
topology: v6e:2x2x1
jax: 0.10.0
libtpu: 0.0.40
codegen_flags: <defaults>
</compile_context>

<pallas_src>
import jax
import jax.numpy as jnp
from jax.experimental import pallas as pl
from jax.experimental.pallas import tpu as pltpu


def _round_up(n, m):
    return (n + m - 1) // m * m


# --------------------------------------------------------------------------
# Fused kernel: squeeze-matmul -> ReLU -> excite-matmul -> sigmoid -> gate.
# --------------------------------------------------------------------------
def _att_kernel(x_ref, w1_ref, w2_ref, o_ref):
    x = x_ref[...]                                                     # (tm, C)
    xf = x.astype(jnp.float32)                                         # f32 elementwise path
    h = jnp.dot(x, w1_ref[...], preferred_element_type=jnp.float32)    # (tm, H)
    h = jnp.maximum(h, 0.0)                                            # ReLU
    s = jnp.dot(h.astype(w2_ref.dtype), w2_ref[...],
                preferred_element_type=jnp.float32)                    # (tm, C)
    y = jax.nn.sigmoid(s)                                              # stable sigmoid (EUP)
    o_ref[...] = (xf * y).astype(o_ref.dtype)


def attention_block_forward(x, w1, w2, *,
                            max_tile_rows=2048,
                            vmem_budget_bytes=12 << 20):
    """x: (..., C);  w1: (C, H) = W1ᵀ;  w2: (H, C) = W2ᵀ."""
    C = x.shape[-1]
    H = w1.shape[1]
    assert w1.shape == (C, H) and w2.shape == (H, C), (w1.shape, w2.shape)
    orig_shape = x.shape

    x2 = x.reshape(-1, C)        # cheap metadata reshape (last dim preserved)
    M = x2.shape[0]

    itemsize = jnp.dtype(x.dtype).itemsize
    # Double-buffered x-in + out slabs ~= 4 * tm * C * itemsize bytes.  Keep
    # under the budget (safe on v5e 16 MiB scoped default; plenty of headroom
    # for the ~KiB-sized resident weights and pipeline internals).
    tm_vmem = max(8, (vmem_budget_bytes // (4 * C * itemsize)) // 8 * 8)
    # Guarantee >= 2 grid steps so v7x's two TensorCores can both stream.
    tm_half = max(8, _round_up(pl.cdiv(M, 2), 8))
    tm = max(8, min(max_tile_rows, tm_vmem, tm_half))

    grid = (pl.cdiv(M, tm),)     # ragged last block handled by Pallas — no pad/slice

    out = pl.pallas_call(
        _att_kernel,
        out_shape=jax.ShapeDtypeStruct((M, C), x.dtype),
        grid_spec=pltpu.PrefetchScalarGridSpec(
            num_scalar_prefetch=0,
            grid=grid,
            in_specs=[
                pl.BlockSpec((tm, C), lambda i: (i, 0)),   # x row slab (lane-dense)
                pl.BlockSpec((C, H), lambda i: (0, 0)),    # W1ᵀ, resident
                pl.BlockSpec((H, C), lambda i: (0, 0)),    # W2ᵀ, resident
            ],
            out_specs=pl.BlockSpec((tm, C), lambda i: (i, 0)),
        ),
        compiler_params=pltpu.CompilerParams(
            dimension_semantics=("parallel",),             # megacore-shardable on v7x
        ),
    )(x2, w1, w2)

    return out.reshape(orig_shape)


# --------------------------------------------------------------------------
# Parameter init (PyTorch nn.Linear default: U(-1/sqrt(fan_in), 1/sqrt(fan_in)),
# bias=False) and a pure-JAX reference.
# --------------------------------------------------------------------------
def init_params(key, channel, reduction=16, dtype=jnp.float32):
    hidden = channel // reduction
    k1, k2 = jax.random.split(key)
    b1 = 1.0 / (channel ** 0.5)
    b2 = 1.0 / (hidden ** 0.5)
    # stored pre-transposed: w1 = W1ᵀ (C, H), w2 = W2ᵀ (H, C)
    w1 = jax.random.uniform(k1, (channel, hidden), minval=-b1, maxval=b1).astype(dtype)
    w2 = jax.random.uniform(k2, (hidden, channel), minval=-b2, maxval=b2).astype(dtype)
    return w1, w2


def reference(x, w1, w2):
    h = jnp.maximum(x @ w1, 0.0)
    y = jax.nn.sigmoid(h @ w2)
    return x * y


if __name__ == "__main__":
    key = jax.random.PRNGKey(0)
    k_x, k_p = jax.random.split(key)

    # channel=128 with reduction=16 -> hidden=8; x has a (batch, seq) prefix,
    # Linear layers apply to the last (channel) dim as in the PyTorch module.
    B, S, C, reduction = 2, 8, 128, 16
    x = jax.random.normal(k_x, (B, S, C), dtype=jnp.float32)
    w1, w2 = init_params(k_p, C, reduction)

    out = jax.block_until_ready(attention_block_forward(x, w1, w2))
    ref = jax.block_until_ready(reference(x, w1, w2))

    assert out.shape == x.shape, out.shape
    assert jnp.allclose(out, ref, atol=1e-3, rtol=1e-3), \
        float(jnp.max(jnp.abs(out - ref)))

    # Also exercise a shape where M is NOT a multiple of the row tile
    # (ragged last block path, no wrapper pad/slice).
    x2 = jax.random.normal(k_x, (3, 7, C), dtype=jnp.float32)
    out2 = jax.block_until_ready(attention_block_forward(x2, w1, w2))
    ref2 = jax.block_until_ready(reference(x2, w1, w2))
    assert out2.shape == x2.shape, out2.shape
    assert jnp.allclose(out2, ref2, atol=1e-3, rtol=1e-3), \
        float(jnp.max(jnp.abs(out2 - ref2)))

    print("KERNEL_OK")
</pallas_src>

<mosaic_0001>
module attributes {stable_mosaic.version = 11 : i64} {
  func.func @_att_kernel(%arg0: i32, %arg1: memref<8x128xf32, #tpu.memory_space<vmem>>, %arg2: memref<128x8xf32, #tpu.memory_space<vmem>>, %arg3: memref<8x128xf32, #tpu.memory_space<vmem>>, %arg4: memref<8x128xf32, #tpu.memory_space<vmem>>) attributes {dimension_semantics = [#tpu.dimension_semantics<parallel>], iteration_bounds = array<i64: 2>, scalar_prefetch = 0 : i64, scratch_operands = 0 : i64, tpu.core_type = #tpu.core_type<tc>, window_params = [{transform_indices = @transform_0, window_bounds = array<i64: 8, 128>}, {pipeline_mode = #tpu.pipeline_mode<synchronous>, transform_indices = @transform_1, window_bounds = array<i64: 128, 8>}, {pipeline_mode = #tpu.pipeline_mode<synchronous>, transform_indices = @transform_2, window_bounds = array<i64: 8, 128>}, {transform_indices = @transform_3, window_bounds = array<i64: 8, 128>}]} {
    %c0 = arith.constant 0 : index
    %c0_0 = arith.constant 0 : index
    %0 = vector.load %arg1[%c0, %c0_0] : memref<8x128xf32, #tpu.memory_space<vmem>>, vector<8x128xf32>
    %c0_1 = arith.constant 0 : index
    %c0_2 = arith.constant 0 : index
    %1 = vector.load %arg2[%c0_1, %c0_2] : memref<128x8xf32, #tpu.memory_space<vmem>>, vector<128x8xf32>
    %cst = arith.constant dense<0.000000e+00> : vector<8x8xf32>
    %2 = tpu.matmul %0, %1, %cst {dimension_numbers = #tpu.dot_dimension_numbers<[1], [0], [0], [1], [0, 0, 1, 1], [], []>} : vector<8x128xf32>, vector<128x8xf32>, vector<8x8xf32> -> vector<8x8xf32>
    %cst_3 = arith.constant 0.000000e+00 : f32
    %3 = vector.broadcast %cst_3 : f32 to vector<8x8xf32>
    %4 = arith.maximumf %2, %3 : vector<8x8xf32>
    %c0_4 = arith.constant 0 : index
    %c0_5 = arith.constant 0 : index
    %5 = vector.load %arg3[%c0_4, %c0_5] : memref<8x128xf32, #tpu.memory_space<vmem>>, vector<8x128xf32>
    %cst_6 = arith.constant dense<0.000000e+00> : vector<8x128xf32>
    %6 = tpu.matmul %4, %5, %cst_6 {dimension_numbers = #tpu.dot_dimension_numbers<[1], [0], [0], [1], [0, 0, 1, 1], [], []>} : vector<8x8xf32>, vector<8x128xf32>, vector<8x128xf32> -> vector<8x128xf32>
    %7 = arith.negf %6 : vector<8x128xf32>
    %8 = math.exp %7 : vector<8x128xf32>
    %cst_7 = arith.constant 1.000000e+00 : f32
    %9 = vector.broadcast %cst_7 : f32 to vector<8x128xf32>
    %10 = arith.addf %9, %8 : vector<8x128xf32>
    %11 = arith.divf %9, %10 : vector<8x128xf32>
    %12 = arith.mulf %0, %11 : vector<8x128xf32>
    %c0_8 = arith.constant 0 : index
    %c0_9 = arith.constant 0 : index
    %13 = vector.load %arg4[%c0_8, %c0_9] : memref<8x128xf32, #tpu.memory_space<vmem>>, vector<8x128xf32>
    tpu.vector_store %arg4[%c0_8, %c0_9], %12 {strides = array<i32>} : memref<8x128xf32, #tpu.memory_space<vmem>>, vector<8x128xf32>,
    return
  }
  func.func @transform_0(%arg0: i32) -> (i32, i32) {
    %c0_i32 = arith.constant 0 : i32
    %c0_i32_0 = arith.constant 0 : i32
    return %arg0, %c0_i32 : i32, i32
  }
  func.func @transform_1(%arg0: i32) -> (i32, i32) {
    %c0_i32 = arith.constant 0 : i32
    %c0_i32_0 = arith.constant 0 : i32
    %c0_i32_1 = arith.constant 0 : i32
    return %c0_i32, %c0_i32_0 : i32, i32
  }
  func.func @transform_2(%arg0: i32) -> (i32, i32) {
    %c0_i32 = arith.constant 0 : i32
    %c0_i32_0 = arith.constant 0 : i32
    %c0_i32_1 = arith.constant 0 : i32
    return %c0_i32, %c0_i32_0 : i32, i32
  }
  func.func @transform_3(%arg0: i32) -> (i32, i32) {
    %c0_i32 = arith.constant 0 : i32
    %c0_i32_0 = arith.constant 0 : i32
    return %arg0, %c0_i32 : i32, i32
  }
}

</mosaic_0001>

<bundles_post_ra>
// kernel: tpu_custom_call.1
= control target key start
LH: loop header
LB: loop body
LE: loop exit
PB: predicated region body
PF: predicated region fallthrough
CT: control target
= control target key end

     0   :  { %8 = vsyncpa [#allocation3], 0  ;;  %s749_s0 = inlined_call_operand.vmem [shape: f32[16,128], index: 0, kind: input, shape index: {}]   ;;  %s750_s1 = inlined_call_operand.vmem [shape: f32[128,8], index: 1, kind: input, shape index: {}]   ;;  %s751_s2 = inlined_call_operand.vmem [shape: f32[8,128], index: 2, kind: input, shape index: {}]   ;;  %s752_s3 = inlined_call_operand.hbm [shape: f32[16,128], index: 3, kind: output, shape index: {}]  }
   0x1   :  { %10 = vsyncpa [#allocation3 + $0x1], 0  ;;  %s611_s12 = smov 0   ;;  %s613_s13 = smov 0  }
   0x2   :  { %s615_s14 = smov 0   ;;  %s617_s15 = smov 0  }
   0x3 LB: > { %s632_s16 = sadd.s32 4294967295, %s586_s15   ;;  %s410_s17 = sadd.s32 4294967294, %s586_s15   ;;  %s586_s15 = sphi %s617_s15, %s758_s15   ;;  %s582_s14 = sphi %s615_s14, %s757_s14   ;;  %s578_s13 = sphi %s613_s13, %s756_s13   ;;  %s574_s12 = sphi %s611_s12, %s755_s12  }
   0x4   : > { %s636_s18 = sadd.s32 1, %s586_s15   ;;  %s91_s19 = sadd.s32 1, %s582_s14 }
   0x5   : > { %s88_s20 = ssub.s32 %s586_s15, %s636_s18  ;;  %p101_p0 = scmp.ne.s32.totalorder %s582_s14, %s578_s13 }
   0x6   : > { %p89_p1 = scmp.eq.s32.totalorder %s88_s20, 0  ;;  %p102_p2 = scmp.eq.s32.totalorder %s632_s16, 1 }
   0x7   : > { %p107_p3 = scmp.ne.s32.totalorder %s578_s13, %s574_s12  ;;  %p108_p4 = scmp.eq.s32.totalorder %s410_s17, 1 }
   0x8   : > { %s647_s21 = scalar_select %p89_p1, %s582_s14, %s91_s19  }
   0x9   : > { %p649_p5 = por %p102_p2, %p101_p0  ;;  %p653_p6 = por %p108_p4, %p107_p3 }
   0xa   : > { %p413_p7 = scmp.ge.s32.totalorder %s586_s15, 1  ;;  %p139_p8 = scmp.lt.s32.totalorder %s586_s15, 3 }
   0xc   : > { %p140_p9 = pnand %p413_p7, %p139_p8 }
   0xd   : > { %p162_p10 = scmp.lt.s32.totalorder (!%p140_p9), %s632_s16, 1  ;;  %s159_s27 = sand.u32 (!%p140_p9), 1, %s578_s13  }
   0xe   : > { %143 = sbr.rel (%p140_p9) target bundleno = 487 (0x1e7), region = 32  ;;  %s419_s29 = sshll.u32 (!%p140_p9), %s632_s16, 7 }
   0xf   : > { %s349_s7 = scalar_lea.hbm (!%p140_p9), %s752_s3, %s419_s29  ;;  %s338_s8 = scalar_lea.sflag (!%p140_p9), [#allocation3], %s159_s27 }
  0x10   : > { %s590_s10 = smov (!%p140_p9), [#allocation2]  }
  0x11   : > { %s530_s11 = sshll.u32 (!%p140_p9), %s590_s10, 4  ;;  %s531_s11 = int_to_ptr.vmem [resolvable:$false] %s530_s11 }
  0x13   : > { %v182_v0 = vld [vmem:[%s750_s1 + $0x78] sm:$0xff]  ;;  %v588_v1 = vmov 0.0   ;;  %v181_v2 = vld [vmem:[%s750_s1 + $0x70] sm:$0xff]  ;;  %vm589_vm0 = vmmov 0   ;;  %v180_v3 = vld [vmem:[%s750_s1 + $0x68] sm:$0xff]  ;;  %s163_s28 = scalar_select %p162_p10, %s632_s16, 1 }
  0x14   : > { %441 = vmatprep.subr.mxu0 %v588_v1  ;;  %473 = vmatprep.mubr.msk.f32.mxu0 %vm589_vm0, %v588_v1  ;;  %v179_v4 = vld [vmem:[%s750_s1 + $0x60] sm:$0xff]  ;;  %v178_v5 = vld [vmem:[%s750_s1 + $0x58] sm:$0xff]  ;;  %v177_v6 = vld [vmem:[%s750_s1 + $0x50] sm:$0xff]  ;;  %vm255_vm1 = vcmask 64512   ;;  %s532_s16 = scalar_lea.vmem %s531_s11, 256 }
  0x15   : > { %442 = vmatpush3.msra.mxu0 %v182_v0  ;;  %476 = vmatprep.subr.mxu1 %v588_v1  ;;  %v176_v7 = vld [vmem:[%s750_s1 + $0x48] sm:$0xff]  ;;  %v175_v8 = vld [vmem:[%s750_s1 + $0x40] sm:$0xff]  ;;  %v174_v9 = vld [vmem:[%s750_s1 + $0x38] sm:$0xff]  ;;  %s415_s6 = sshll.u32 %s163_s28, 3  ;;  %s414_s28 = sshll.u32 %s159_s27, 3 }
  0x16   : > { %443 = vmatprep.subr.mxu0 %v588_v1  ;;  %478 = vmatprep.mubr.msk.f32.mxu1 %vm589_vm0, %v588_v1  ;;  %v173_v10 = vld [vmem:[%s750_s1 + $0x30] sm:$0xff]  ;;  %v172_v11 = vld [vmem:[%s750_s1 + $0x28] sm:$0xff]  ;;  %v171_v12 = vld [vmem:[%s750_s1 + $0x20] sm:$0xff]  ;;  %s165_s19 = scalar_lea.vmem %s749_s0, %s415_s6  ;;  %s161_s30 = scalar_lea.vmem [#allocation2], %s414_s28 }
  0x17   : > { %444 = vmatpush3.msra.mxu0 %v181_v2  ;;  %v170_v13 = vld [vmem:[%s750_s1 + $0x18] sm:$0xff]  ;;  %v169_v14 = vld [vmem:[%s750_s1 + $0x10] sm:$0xff]  ;;  %v168_v15 = vld [vmem:[%s750_s1 + $0x8] sm:$0xff]  ;;  %s351_s4 = sshll.u32 %s161_s30, 4  ;;  %s352_s4 = int_to_ptr.vmem [resolvable:$true] %s351_s4 }
  0x18   : > { %445 = vmatprep.subr.mxu0 %v588_v1  ;;  %v167_v16 = vld [vmem:[%s750_s1] sm:$0xff]  ;;  %s526_s9 = scalar_lea.vmem %s352_s4, 128  ;;  %p533_p0 = scmp.lt.s32.totalorder %s352_s4, %s531_s11 }
  0x19   : > { %446 = vmatpush3.msra.mxu0 %v180_v3  ;;  %v166_v17 = vld [vmem:[%s165_s19] sm:$0xff]  ;;  %p527_p11 = scmp.ne.s32.totalorder %s352_s4, %s526_s9  ;;  %p534_p1 = scmp.lt.s32.totalorder %s532_s16, %s526_s9 }
  0x1a   : > { %447 = vmatprep.subr.mxu0 %v588_v1  ;;  %v254_v18 = vld [vmem:[%s751_s2] sm:$0xff] }
  0x1b   : > { %448 = vmatpush3.msra.mxu0 %v179_v4  ;;  %477 = vmatpush3.msra.mxu1 %v254_v18  ;;  %p528_p12 = pnand %p527_p11, %p649_p5  ;;  %p535_p2 = por %p534_p1, %p533_p0 }
  0x1c   : > { %449 = vmatprep.subr.mxu0 %v588_v1 }
  0x1d   : > { %450 = vmatpush3.msra.mxu0 %v178_v5  ;;  %p529_p13 = pneg %p528_p12 }
  0x1e   : > { %451 = vmatprep.subr.mxu0 %v588_v1 }
  0x1f   : > { %452 = vmatpush3.msra.mxu0 %v177_v6  ;;  %p536_p3 = pnand %p535_p2, %p529_p13 }
  0x20   : > { %453 = vmatprep.subr.mxu0 %v588_v1 }
  0x21   : > { %454 = vmatpush3.msra.mxu0 %v176_v7 }
  0x22   : > { %455 = vmatprep.subr.mxu0 %v588_v1 }
  0x23   : > { %456 = vmatpush3.msra.mxu0 %v175_v8 }
  0x24   : > { %457 = vmatprep.subr.mxu0 %v588_v1 }
  0x25   : > { %458 = vmatpush3.msra.mxu0 %v174_v9 }
  0x26   : > { %459 = vmatprep.subr.mxu0 %v588_v1 }
  0x27   : > { %460 = vmatpush3.msra.mxu0 %v173_v10 }
  0x28   : > { %461 = vmatprep.subr.mxu0 %v588_v1 }
  0x29   : > { %462 = vmatpush3.msra.mxu0 %v172_v11 }
  0x2a   : > { %463 = vmatprep.subr.mxu0 %v588_v1 }
  0x2b   : > { %464 = vmatpush3.msra.mxu0 %v171_v12 }
  0x2c   : > { %465 = vmatprep.subr.mxu0 %v588_v1 }
  0x2d   : > { %466 = vmatpush3.msra.mxu0 %v170_v13 }
  0x2e   : > { %467 = vmatprep.subr.mxu0 %v588_v1 }
  0x2f   : > { %468 = vmatpush3.msra.mxu0 %v169_v14 }
  0x30   : > { %469 = vmatprep.subr.mxu0 %v588_v1 }
  0x31   : > { %470 = vmatpush3.msra.mxu0 %v168_v15 }
  0x32   : > { %471 = vmatprep.subr.mxu0 %v588_v1 }
  0x33   : > { %472 = vmatpush3.msra.mxu0 %v167_v16 }
  0x34   : > { %474 = vmatmul.mubr.f32.vlgmr.msra.gmra.mxu0 %v166_v17 }
  0xf4   : > { %v249_v19 = vpop.f32.mrf.mxu0 }
  0xf5   : > { %v253_v20 = vmax.f32 %v249_v19, 0.0 }
  0xf6   : > { %v475_v21 = vpop.f32.mrf.mxu0 }
  0xf7   : > { %479 = vmatmul.mubr.msk.f32.vlgmr.msra.gmra.mxu1 %vm255_vm1, %v253_v20 }
 0x1b7   : > { %v325_v22 = vpop.f32.mrf.mxu1 }
 0x1b8   : > { %v417_v23 = vmul.f32 -1.442695, %v325_v22 }
 0x1b9   : > { %v480_v24 = vpop.f32.mrf.mxu1 }
 0x1ba   : > { %522 = vpow2.f32 %v417_v23 }
 0x1c7   : > { %v523_v25 = vpop.eup %522 }
 0x1c8   : > { %v332_v26 = vadd.f32 1.0, %v523_v25 }
 0x1ca   : > { %524 = vrcp.f32 %v332_v26 }
 0x1d7   : > { %v525_v27 = vpop.eup %524 }
 0x1d8   : > { %v335_v28 = vmul.f32 %v525_v27, %v166_v17 }
 0x1da   : > { %336 = vst [vmem:[%s161_s30] sm:$0xff] %v335_v28 }
 0x1db   : > { %539 = shalt.err (!%p536_p3)
}
 0x1dc   : > { %s540_s17 = scalar_lea.hbm %s349_s7, 128  ;;  %s544_s24 = scalar_lea.hbm %s752_s3, 256 }
 0x1dd   : > { %p541_p4 = scmp.ne.s32.totalorder %s349_s7, %s540_s17  ;;  %p545_p9 = scmp.lt.s32.totalorder %s349_s7, %s752_s3 }
 0x1de   : > { %p546_p10 = scmp.lt.s32.totalorder %s544_s24, %s540_s17 }
 0x1df   : > { %p542_p7 = pnand %p541_p4, %p649_p5 }
 0x1e0   : > { %p547_p11 = por %p546_p10, %p545_p9 }
 0x1e1   : > { %p543_p8 = pneg %p542_p7 }
 0x1e3   : > { %p548_p12 = pnand %p547_p11, %p543_p8 }
 0x1e5   : > { %551 = shalt.err (!%p548_p12)
}
 0x1e6   : > { %481 = dma.vmem_to_hbm [thread:$0]  (%p649_p5), %s352_s4, 128, %s349_s7, %s338_s8  }
 0x1e7 PF: > { %p487_p13 = scmp.ge.s32.totalorder %s586_s15, 2  ;;  %s363_s27 = sand.u32 1, %s574_s12  }
 0x1e8   : > { %s364_s28 = scalar_lea.sflag [#allocation3], %s363_s27 }
 0x1e9   : > { %p484_p0 = pnand %p487_p13, %p653_p6 }
 0x1eb   : > { %p485_p1 = pneg %p484_p0 }
 0x1ed   : > { %569 = dma.done.wait (%p485_p1), %s364_s28, 128  }
 0x1ee   : > { %571 = vsyncadd (%p485_p1), %s364_s28, 4294967168  ;;  %p13_p2 = scmp.ge.s32.totalorder %s636_s18, 4   ;;  %s755_s12 = smov %s578_s13 }
 0x1ef   : > { %s756_s13 = smov %s582_s14  ;;  %s757_s14 = smov %s647_s21 }
 0x1f0   : > { %s758_s15 = smov %s636_s18  ;;  %15 = sbr.rel (!%p13_p2) target bundleno = 3 (0x3), region = 67 }
 0x1f5   :  { %369 = vsyncpa [#allocation3], 1 }
 0x1f6   :  { %371 = vsyncpa [#allocation3 + $0x1], 1 }

</bundles_post_ra>
